<compile_context>
chip_gen: v6e
topology: v6e:2x2x1
jax: 0.10.0
libtpu: 0.0.40
codegen_flags: <defaults>
</compile_context>

<pallas_src>
import jax
import jax.numpy as jnp
import numpy as np
from jax.experimental import pallas as pl
from jax.experimental.pallas import tpu as pltpu

D_S1, D_S2 = 5, 2            # state1_dim, state2_dim
D_IN = D_S1 + D_S2           # 7
H1, H2, D_OUT = 128, 64, 1   # layer widths from the PyTorch module


def _round_up(n, m):
    return ((n + m - 1) // m) * m


def _score_kernel(s1_ref, s2_ref, w1a_ref, w1b_ref, b1_ref,
                  w2_ref, b2_ref, w3_ref, b3_ref, out_ref):
    # s1_ref: (rows, 5), s2_ref: (rows, 2)
    # w1a: (5, 128), w1b: (2, 128)  -- split layer-1 weight (no concat needed)
    # w3 : (1, 64) row vector, b3 in SMEM as a (1, 1) scalar.
    # Layer 1: split-K matmul, f32 accumulation.
    h1 = (jnp.dot(s1_ref[...], w1a_ref[...], preferred_element_type=jnp.float32)
          + jnp.dot(s2_ref[...], w1b_ref[...], preferred_element_type=jnp.float32)
          + b1_ref[...])
    h1 = jnp.maximum(h1, 0.0)                                       # ReLU
    # Layer 2.
    h2 = (jnp.dot(h1.astype(w2_ref.dtype), w2_ref[...],
                  preferred_element_type=jnp.float32)
          + b2_ref[...])
    h2 = jnp.maximum(h2, 0.0)                                       # ReLU
    # Layer 3 (64 -> 1), produced lane-dense as a (1, rows) row.
    score = jax.lax.dot_general(
        w3_ref[...], h2.astype(w3_ref.dtype),
        dimension_numbers=(((1,), (1,)), ((), ())),
        preferred_element_type=jnp.float32)                         # (1, rows)
    out_ref[...] = score + b3_ref[0, 0]


def score_forward(s1, s2, params, block_rows=1024, compute_dtype=jnp.float32):
    """s1: (B, 5), s2: (B, 2) -> (B, 1) f32 score."""
    w1, b1, w2, b2, w3, b3 = params
    B = s1.shape[0]

    # Cast matmul operands (inputs + weights) to the compute dtype; biases and
    # accumulation stay f32.
    s1c = s1.astype(compute_dtype)
    s2c = s2.astype(compute_dtype)
    w1a = w1[:D_S1].astype(compute_dtype)   # (5, 128)
    w1b = w1[D_S1:].astype(compute_dtype)   # (2, 128)
    w2c = w2.astype(compute_dtype)
    w3c = w3.astype(compute_dtype)
    b1c = b1.astype(jnp.float32)
    b2c = b2.astype(jnp.float32)
    b3c = b3.astype(jnp.float32)

    # Row tile: multiple of 8 sublanes, no larger than the (padded) batch.
    br = min(block_rows, _round_up(B, 8))
    br = _round_up(br, 8)
    padded_B = _round_up(B, br)
    if padded_B > br:
        # Multiple row tiles: keep tiles lane-aligned so the (1, padded_B)
        # output is written with unmasked, lane-dense stores.
        br = _round_up(br, 128)
        padded_B = _round_up(B, br)
    if padded_B != B:
        pad = padded_B - B
        s1c = jnp.pad(s1c, ((0, pad), (0, 0)))
        s2c = jnp.pad(s2c, ((0, pad), (0, 0)))
    num_tiles = padded_B // br

    out_row = pl.pallas_call(
        _score_kernel,
        out_shape=jax.ShapeDtypeStruct((1, padded_B), jnp.float32),
        grid=(num_tiles,),
        in_specs=[
            pl.BlockSpec((br, D_S1), lambda i: (i, 0)),     # s1 tile
            pl.BlockSpec((br, D_S2), lambda i: (i, 0)),     # s2 tile
            pl.BlockSpec((D_S1, H1), lambda i: (0, 0)),     # w1[:5]
            pl.BlockSpec((D_S2, H1), lambda i: (0, 0)),     # w1[5:]
            pl.BlockSpec((1, H1), lambda i: (0, 0)),        # b1
            pl.BlockSpec((H1, H2), lambda i: (0, 0)),       # w2
            pl.BlockSpec((1, H2), lambda i: (0, 0)),        # b2
            pl.BlockSpec((1, H2), lambda i: (0, 0)),        # w3 (row vector)
            pl.BlockSpec(memory_space=pltpu.MemorySpace.SMEM),  # b3 scalar
        ],
        out_specs=pl.BlockSpec((1, br), lambda i: (0, i)),  # lane-dense row
        compiler_params=pltpu.CompilerParams(
            dimension_semantics=("parallel",)),             # shard rows on v7x
    )(s1c, s2c, w1a, w1b, b1c, w2c, b2c, w3c, b3c)

    # (1, padded_B) row-major == original row order -> (B, 1).
    return out_row.reshape(padded_B, 1)[:B]


def score_reference(s1, s2, params):
    """Pure-JAX replica of the PyTorch Score.forward for verification."""
    w1, b1, w2, b2, w3, b3 = params
    x = jnp.concatenate([s1, s2], axis=-1)
    h1 = jnp.maximum(x @ w1 + b1, 0.0)
    h2 = jnp.maximum(h1 @ w2 + b2, 0.0)
    return h2 @ w3.T + b3


def init_score_params(key):
    # Kaiming-normal-style init (nonlinearity='relu'), matching the module's
    # layer shapes. Weights stored input-major; layer3 weight as (1, 64) row.
    k1, k2, k3 = jax.random.split(key, 3)
    w1 = jax.random.normal(k1, (D_IN, H1), jnp.float32) * jnp.sqrt(2.0 / D_IN)
    b1 = jnp.zeros((1, H1), jnp.float32)
    w2 = jax.random.normal(k2, (H1, H2), jnp.float32) * jnp.sqrt(2.0 / H1)
    b2 = jnp.zeros((1, H2), jnp.float32)
    w3 = jax.random.normal(k3, (1, H2), jnp.float32) * jnp.sqrt(2.0 / H2)
    b3 = jnp.zeros((1, 1), jnp.float32)
    return (w1, b1, w2, b2, w3, b3)


if __name__ == "__main__":
    key = jax.random.PRNGKey(0)
    k1, k2, k3, k4, kp = jax.random.split(key, 5)
    params = init_score_params(kp)

    # 1) Tiny batch (single tile, default settings).
    B_small = 8
    s1 = jax.random.normal(k1, (B_small, D_S1), jnp.float32)
    s2 = jax.random.normal(k2, (B_small, D_S2), jnp.float32)
    out = jax.block_until_ready(score_forward(s1, s2, params))
    ref = jax.block_until_ready(score_reference(s1, s2, params))
    assert out.shape == (B_small, D_OUT)
    np.testing.assert_allclose(np.asarray(out), np.asarray(ref),
                               rtol=1e-4, atol=1e-4)

    # 2) Ragged batch: multi-tile, padded, "parallel" row grid (f32 path).
    B_big = 1000
    s1b = jax.random.normal(k3, (B_big, D_S1), jnp.float32)
    s2b = jax.random.normal(k4, (B_big, D_S2), jnp.float32)
    outb = jax.block_until_ready(score_forward(s1b, s2b, params,
                                               block_rows=256))
    refb = jax.block_until_ready(score_reference(s1b, s2b, params))
    assert outb.shape == (B_big, D_OUT)
    np.testing.assert_allclose(np.asarray(outb), np.asarray(refb),
                               rtol=1e-4, atol=1e-4)

    # 3) bf16 MXU path (f32 accumulation) -- looser tolerance by design.
    outh = jax.block_until_ready(score_forward(s1b, s2b, params,
                                               block_rows=256,
                                               compute_dtype=jnp.bfloat16))
    assert outh.shape == (B_big, D_OUT)
    np.testing.assert_allclose(np.asarray(outh), np.asarray(refb),
                               rtol=5e-2, atol=2.5e-1)

    print("KERNEL_OK")
</pallas_src>

<mosaic_0001>
module attributes {stable_mosaic.version = 11 : i64} {
  func.func @_score_kernel(%arg0: i32, %arg1: memref<8x5xf32, #tpu.memory_space<vmem>>, %arg2: memref<8x2xf32, #tpu.memory_space<vmem>>, %arg3: memref<5x128xf32, #tpu.memory_space<vmem>>, %arg4: memref<2x128xf32, #tpu.memory_space<vmem>>, %arg5: memref<1x128xf32, #tpu.memory_space<vmem>>, %arg6: memref<128x64xf32, #tpu.memory_space<vmem>>, %arg7: memref<1x64xf32, #tpu.memory_space<vmem>>, %arg8: memref<1x64xf32, #tpu.memory_space<vmem>>, %arg9: memref<1x1xf32, #tpu.memory_space<smem>>, %arg10: memref<1x8xf32, #tpu.memory_space<vmem>>) attributes {dimension_semantics = [#tpu.dimension_semantics<parallel>], iteration_bounds = array<i64: 1>, scalar_prefetch = 0 : i64, scratch_operands = 0 : i64, tpu.core_type = #tpu.core_type<tc>, window_params = [{transform_indices = @transform_0, window_bounds = array<i64: 8, 5>}, {transform_indices = @transform_1, window_bounds = array<i64: 8, 2>}, {pipeline_mode = #tpu.pipeline_mode<synchronous>, transform_indices = @transform_2, window_bounds = array<i64: 5, 128>}, {pipeline_mode = #tpu.pipeline_mode<synchronous>, transform_indices = @transform_3, window_bounds = array<i64: 2, 128>}, {pipeline_mode = #tpu.pipeline_mode<synchronous>, transform_indices = @transform_4, window_bounds = array<i64: 1, 128>}, {pipeline_mode = #tpu.pipeline_mode<synchronous>, transform_indices = @transform_5, window_bounds = array<i64: 128, 64>}, {pipeline_mode = #tpu.pipeline_mode<synchronous>, transform_indices = @transform_6, window_bounds = array<i64: 1, 64>}, {pipeline_mode = #tpu.pipeline_mode<synchronous>, transform_indices = @transform_7, window_bounds = array<i64: 1, 64>}, {transform_indices = @transform_8, window_bounds = array<i64: 1, 1>}, {transform_indices = @transform_9, window_bounds = array<i64: 1, 8>}]} {
    %c0 = arith.constant 0 : index
    %c0_0 = arith.constant 0 : index
    %0 = vector.load %arg1[%c0, %c0_0] : memref<8x5xf32, #tpu.memory_space<vmem>>, vector<8x5xf32>
    %c0_1 = arith.constant 0 : index
    %c0_2 = arith.constant 0 : index
    %1 = vector.load %arg3[%c0_1, %c0_2] : memref<5x128xf32, #tpu.memory_space<vmem>>, vector<5x128xf32>
    %cst = arith.constant dense<0.000000e+00> : vector<8x128xf32>
    %2 = tpu.matmul %0, %1, %cst {dimension_numbers = #tpu.dot_dimension_numbers<[1], [0], [0], [1], [0, 0, 1, 1], [], []>} : vector<8x5xf32>, vector<5x128xf32>, vector<8x128xf32> -> vector<8x128xf32>
    %c0_3 = arith.constant 0 : index
    %c0_4 = arith.constant 0 : index
    %3 = vector.load %arg2[%c0_3, %c0_4] : memref<8x2xf32, #tpu.memory_space<vmem>>, vector<8x2xf32>
    %c0_5 = arith.constant 0 : index
    %c0_6 = arith.constant 0 : index
    %4 = vector.load %arg4[%c0_5, %c0_6] : memref<2x128xf32, #tpu.memory_space<vmem>>, vector<2x128xf32>
    %cst_7 = arith.constant dense<0.000000e+00> : vector<8x128xf32>
    %5 = tpu.matmul %3, %4, %cst_7 {dimension_numbers = #tpu.dot_dimension_numbers<[1], [0], [0], [1], [0, 0, 1, 1], [], []>} : vector<8x2xf32>, vector<2x128xf32>, vector<8x128xf32> -> vector<8x128xf32>
    %6 = arith.addf %2, %5 : vector<8x128xf32>
    %c0_8 = arith.constant 0 : index
    %c0_9 = arith.constant 0 : index
    %7 = vector.load %arg5[%c0_8, %c0_9] : memref<1x128xf32, #tpu.memory_space<vmem>>, vector<1x128xf32>
    %8 = vector.broadcast %7 : vector<1x128xf32> to vector<8x128xf32>
    %9 = arith.addf %6, %8 : vector<8x128xf32>
    %cst_10 = arith.constant 0.000000e+00 : f32
    %10 = vector.broadcast %cst_10 : f32 to vector<8x128xf32>
    %11 = arith.maximumf %9, %10 : vector<8x128xf32>
    %c0_11 = arith.constant 0 : index
    %c0_12 = arith.constant 0 : index
    %12 = vector.load %arg6[%c0_11, %c0_12] : memref<128x64xf32, #tpu.memory_space<vmem>>, vector<128x64xf32>
    %cst_13 = arith.constant dense<0.000000e+00> : vector<8x64xf32>
    %13 = tpu.matmul %11, %12, %cst_13 {dimension_numbers = #tpu.dot_dimension_numbers<[1], [0], [0], [1], [0, 0, 1, 1], [], []>} : vector<8x128xf32>, vector<128x64xf32>, vector<8x64xf32> -> vector<8x64xf32>
    %c0_14 = arith.constant 0 : index
    %c0_15 = arith.constant 0 : index
    %14 = vector.load %arg7[%c0_14, %c0_15] : memref<1x64xf32, #tpu.memory_space<vmem>>, vector<1x64xf32>
    %15 = vector.broadcast %14 : vector<1x64xf32> to vector<8x64xf32>
    %16 = arith.addf %13, %15 : vector<8x64xf32>
    %cst_16 = arith.constant 0.000000e+00 : f32
    %17 = vector.broadcast %cst_16 : f32 to vector<8x64xf32>
    %18 = arith.maximumf %16, %17 : vector<8x64xf32>
    %c0_17 = arith.constant 0 : index
    %c0_18 = arith.constant 0 : index
    %19 = vector.load %arg8[%c0_17, %c0_18] : memref<1x64xf32, #tpu.memory_space<vmem>>, vector<1x64xf32>
    %cst_19 = arith.constant dense<0.000000e+00> : vector<1x8xf32>
    %20 = tpu.matmul %19, %18, %cst_19 {dimension_numbers = #tpu.dot_dimension_numbers<[1], [1], [0], [0], [0, 0, 1, 0], [], []>} : vector<1x64xf32>, vector<8x64xf32>, vector<1x8xf32> -> vector<1x8xf32>
    %c0_20 = arith.constant 0 : index
    %c0_21 = arith.constant 0 : index
    %21 = memref.load %arg9[%c0_20, %c0_21] : memref<1x1xf32, #tpu.memory_space<smem>>
    %22 = vector.broadcast %21 : f32 to vector<1x8xf32>
    %23 = arith.addf %20, %22 : vector<1x8xf32>
    %c0_22 = arith.constant 0 : index
    %c0_23 = arith.constant 0 : index
    %24 = vector.load %arg10[%c0_22, %c0_23] : memref<1x8xf32, #tpu.memory_space<vmem>>, vector<1x8xf32>
    tpu.vector_store %arg10[%c0_22, %c0_23], %23 {strides = array<i32>} : memref<1x8xf32, #tpu.memory_space<vmem>>, vector<1x8xf32>,
    return
  }
  func.func @transform_0(%arg0: i32) -> (i32, i32) {
    %c0_i32 = arith.constant 0 : i32
    %c0_i32_0 = arith.constant 0 : i32
    return %arg0, %c0_i32 : i32, i32
  }
  func.func @transform_1(%arg0: i32) -> (i32, i32) {
    %c0_i32 = arith.constant 0 : i32
    %c0_i32_0 = arith.constant 0 : i32
    return %arg0, %c0_i32 : i32, i32
  }
  func.func @transform_2(%arg0: i32) -> (i32, i32) {
    %c0_i32 = arith.constant 0 : i32
    %c0_i32_0 = arith.constant 0 : i32
    %c0_i32_1 = arith.constant 0 : i32
    return %c0_i32, %c0_i32_0 : i32, i32
  }
  func.func @transform_3(%arg0: i32) -> (i32, i32) {
    %c0_i32 = arith.constant 0 : i32
    %c0_i32_0 = arith.constant 0 : i32
    %c0_i32_1 = arith.constant 0 : i32
    return %c0_i32, %c0_i32_0 : i32, i32
  }
  func.func @transform_4(%arg0: i32) -> (i32, i32) {
    %c0_i32 = arith.constant 0 : i32
    %c0_i32_0 = arith.constant 0 : i32
    %c0_i32_1 = arith.constant 0 : i32
    return %c0_i32, %c0_i32_0 : i32, i32
  }
  func.func @transform_5(%arg0: i32) -> (i32, i32) {
    %c0_i32 = arith.constant 0 : i32
    %c0_i32_0 = arith.constant 0 : i32
    %c0_i32_1 = arith.constant 0 : i32
    return %c0_i32, %c0_i32_0 : i32, i32
  }
  func.func @transform_6(%arg0: i32) -> (i32, i32) {
    %c0_i32 = arith.constant 0 : i32
    %c0_i32_0 = arith.constant 0 : i32
    %c0_i32_1 = arith.constant 0 : i32
    return %c0_i32, %c0_i32_0 : i32, i32
  }
  func.func @transform_7(%arg0: i32) -> (i32, i32) {
    %c0_i32 = arith.constant 0 : i32
    %c0_i32_0 = arith.constant 0 : i32
    %c0_i32_1 = arith.constant 0 : i32
    return %c0_i32, %c0_i32_0 : i32, i32
  }
  func.func @transform_8(%arg0: i32) -> (i32, i32) {
    %c0_i32 = arith.constant 0 : i32
    %c0_i32_0 = arith.constant 0 : i32
    %c0_i32_1 = arith.constant 0 : i32
    return %c0_i32, %c0_i32_0 : i32, i32
  }
  func.func @transform_9(%arg0: i32) -> (i32, i32) {
    %c0_i32 = arith.constant 0 : i32
    %c0_i32_0 = arith.constant 0 : i32
    return %c0_i32, %arg0 : i32, i32
  }
}

</mosaic_0001>

<bundles_post_ra>
// kernel: tpu_custom_call.1
= control target key start
LH: loop header
LB: loop body
LE: loop exit
PB: predicated region body
PF: predicated region fallthrough
CT: control target
= control target key end

     0   :  { %vm42_vm0 = vcmask 1041408   ;;  %v499_v2 = vmov 0.0   ;;  %vm500_vm1 = vmmov 0   ;;  %vm38_vm2 = vcmask 15360   ;;  %s654_s0 = inlined_call_operand.vmem [shape: f32[8,5], index: 0, kind: input, shape index: {}]   ;;  %s655_s1 = inlined_call_operand.vmem [shape: f32[8,2], index: 1, kind: input, shape index: {}]   ;;  %s656_s2 = inlined_call_operand.vmem [shape: f32[5,128], index: 2, kind: input, shape index: {}]   ;;  %s657_s3 = inlined_call_operand.vmem [shape: f32[2,128], index: 3, kind: input, shape index: {}]   ;;  %s658_s4 = inlined_call_operand.vmem [shape: f32[1,128], index: 4, kind: input, shape index: {}]   ;;  %s659_s5 = inlined_call_operand.vmem [shape: f32[128,64], index: 5, kind: input, shape index: {}]   ;;  %s660_s6 = inlined_call_operand.vmem [shape: f32[1,64], index: 6, kind: input, shape index: {}]   ;;  %s661_s7 = inlined_call_operand.vmem [shape: f32[1,64], index: 7, kind: input, shape index: {}]   ;;  %s662_s8 = inlined_call_operand.<no memory space> [shape: f32[1,1], index: 8, kind: input, shape index: {}]   ;;  %s663_s9 = inlined_call_operand.hbm [shape: f32[1,8], index: 9, kind: output, shape index: {}]  }
   0x1   :  { %v37_v0 = vld [vmem:[%s657_s3] sm:$0x3]  ;;  %424 = vmatprep.subr.mxu1 %v499_v2  ;;  %426 = vmatprep.mubr.msk.f32.mxu1 %vm500_vm1, %v499_v2  ;;  %vm120_vm3 = vcmask 1044480   ;;  %v218_v4 = vld [vmem:[%s659_s5 + $0x78] sm:$0xff]  ;;  %vm116_vm4 = vcmask 39936   ;;  %v217_v6 = vld [vmem:[%s659_s5 + $0x70] sm:$0xff] }
   0x2   :  { %v36_v1 = vld [vmem:[%s655_s1] sm:$0xff]  ;;  %425 = vmatpush3.msk.msra.mxu1 %vm42_vm0, %v37_v0  ;;  %434 = vmatprep.subr.mxu0 %v499_v2 }
   0x3   :  { %v35_v3 = vld [vmem:[%s656_s2] sm:$0x1f]  ;;  %427 = vmatmul.mubr.msk.f32.vlgmr.msra.gmra.mxu1 %vm38_vm2, %v36_v1  ;;  %429 = vmatprep.subr.mxu1 %v499_v2 }
   0x4   :  { %430 = vmatpush3.msk.msra.mxu1 %vm120_vm3, %v35_v3  ;;  %431 = vmatprep.mubr.msk.f32.mxu1 %vm500_vm1, %v499_v2  ;;  %v34_v5 = vld [vmem:[%s654_s0] sm:$0xff] }
   0x5   :  { %435 = vmatpush3.msra.mxu0 %v218_v4  ;;  %466 = vmatprep.mubr.msk.f32.mxu0 %vm500_vm1, %v499_v2 }
   0x6   :  { %15 = vsyncpa [#allocation4], 0  ;;  %436 = vmatprep.subr.mxu0 %v499_v2  ;;  %v216_v7 = vld [vmem:[%s659_s5 + $0x68] sm:$0xff]  ;;  %469 = vmatprep.subr.mxu1 %v499_v2  ;;  %v215_v8 = vld [vmem:[%s659_s5 + $0x60] sm:$0xff]  ;;  %vm300_vm5 = vcmask 523264   ;;  %v299_v35 = vstv %s662_s8  ;;  %s501_s26 = smov [#allocation3]  }
   0x7   :  { %432 = vmatmul.mubr.msk.f32.vlgmr.msra.gmra.mxu1 %vm116_vm4, %v34_v5  ;;  %437 = vmatpush3.msra.mxu0 %v217_v6  ;;  %v214_v9 = vld [vmem:[%s659_s5 + $0x58] sm:$0xff]  ;;  %v213_v10 = vld [vmem:[%s659_s5 + $0x50] sm:$0xff]  ;;  %v212_v11 = vld [vmem:[%s659_s5 + $0x48] sm:$0xff]  ;;  %s385_s27 = sshll.u32 %s501_s26, 4  ;;  %vm377_vm6 = vcmask 57344   ;;  %s386_s27 = int_to_ptr.vmem [resolvable:$true] %s385_s27 }
   0x8   :  { %438 = vmatprep.subr.mxu0 %v499_v2  ;;  %471 = vmatprep.mubr.msk.f32.mxu1 %vm500_vm1, %v499_v2  ;;  %v211_v12 = vld [vmem:[%s659_s5 + $0x40] sm:$0xff]  ;;  %v210_v13 = vld [vmem:[%s659_s5 + $0x38] sm:$0xff]  ;;  %v209_v14 = vld [vmem:[%s659_s5 + $0x30] sm:$0xff]  ;;  %s481_s28 = scalar_lea.vmem %s386_s27, 32  ;;  %p482_p1 = scmp.lt.s32.totalorder %s386_s27, %s386_s27 }
   0x9   :  { %439 = vmatpush3.msra.mxu0 %v216_v7  ;;  %v208_v15 = vld [vmem:[%s659_s5 + $0x28] sm:$0xff]  ;;  %v207_v16 = vld [vmem:[%s659_s5 + $0x20] sm:$0xff]  ;;  %v206_v17 = vld [vmem:[%s659_s5 + $0x18] sm:$0xff] }
   0xa   :  { %440 = vmatprep.subr.mxu0 %v499_v2  ;;  %v205_v18 = vld [vmem:[%s659_s5 + $0x10] sm:$0xff]  ;;  %v204_v19 = vld [vmem:[%s659_s5 + $0x8] sm:$0xff]  ;;  %v203_v20 = vld [vmem:[%s659_s5] sm:$0xff] }
   0xb   :  { %441 = vmatpush3.msra.mxu0 %v215_v8  ;;  %v397_v24 = vld [vmem:[%s658_s4] ss:$0 sm:$0xff] }
   0xc   :  { %442 = vmatprep.subr.mxu0 %v499_v2  ;;  %v398_v29 = vld [vmem:[%s660_s6] ss:$0 sm:$0xff]  ;;  %s477_s6 = scalar_lea.vmem %s386_s27, 16 }
   0xd   :  { %443 = vmatpush3.msra.mxu0 %v214_v9  ;;  %v297_v34 = vld [vmem:[%s661_s7] sm:$0x1]  ;;  %p478_p0 = scmp.ne.s32.totalorder %s386_s27, %s477_s6  ;;  %p483_p2 = scmp.lt.s32.totalorder %s481_s28, %s477_s6 }
   0xe   :  { %444 = vmatprep.subr.mxu0 %v499_v2 }
   0xf   :  { %445 = vmatpush3.msra.mxu0 %v213_v10  ;;  %p484_p3 = por %p483_p2, %p482_p1 }
  0x10   :  { %446 = vmatprep.subr.mxu0 %v499_v2 }
  0x11   :  { %447 = vmatpush3.msra.mxu0 %v212_v11  ;;  %p485_p4 = pnand %p484_p3, %p478_p0 }
  0x12   :  { %448 = vmatprep.subr.mxu0 %v499_v2 }
  0x13   :  { %449 = vmatpush3.msra.mxu0 %v211_v12 }
  0x14   :  { %450 = vmatprep.subr.mxu0 %v499_v2 }
  0x15   :  { %451 = vmatpush3.msra.mxu0 %v210_v13 }
  0x16   :  { %452 = vmatprep.subr.mxu0 %v499_v2 }
  0x17   :  { %453 = vmatpush3.msra.mxu0 %v209_v14 }
  0x18   :  { %454 = vmatprep.subr.mxu0 %v499_v2 }
  0x19   :  { %455 = vmatpush3.msra.mxu0 %v208_v15 }
  0x1a   :  { %456 = vmatprep.subr.mxu0 %v499_v2 }
  0x1b   :  { %457 = vmatpush3.msra.mxu0 %v207_v16 }
  0x1c   :  { %458 = vmatprep.subr.mxu0 %v499_v2 }
  0x1d   :  { %459 = vmatpush3.msra.mxu0 %v206_v17 }
  0x1e   :  { %460 = vmatprep.subr.mxu0 %v499_v2 }
  0x1f   :  { %461 = vmatpush3.msra.mxu0 %v205_v18 }
  0x20   :  { %462 = vmatprep.subr.mxu0 %v499_v2 }
  0x21   :  { %463 = vmatpush3.msra.mxu0 %v204_v19 }
  0x22   :  { %464 = vmatprep.subr.mxu0 %v499_v2 }
  0x23   :  { %465 = vmatpush3.msra.mxu0 %v203_v20 }
  0xc3   :  { %v112_v21 = vpop.f32.mrf.mxu1 }
  0xc5   :  { %v428_v22 = vpop.f32.mrf.mxu1 }
  0xc7   :  { %v190_v23 = vpop.f32.mrf.mxu1 }
  0xc8   :  { %v191_v25 = vadd.f32 %v190_v23, %v112_v21 }
  0xc9   :  { %v433_v26 = vpop.f32.mrf.mxu1 }
  0xca   :  { %v201_v27 = vadd.f32 %v397_v24, %v191_v25 }
  0xcc   :  { %v202_v28 = vmax.f32 %v201_v27, 0.0 }
  0xce   :  { %467 = vmatmul.mubr.f32.vlgmr.msra.gmra.mxu0 %v202_v28 }
 0x18e   :  { %v292_v30 = vpop.f32.mrf.mxu0 }
 0x18f   :  { %v293_v31 = vadd.f32 %v398_v29, %v292_v30 }
 0x190   :  { %v468_v32 = vpop.f32.mrf.mxu0 }
 0x191   :  { %v296_v33 = vmax.f32 %v293_v31, 0.0 }
 0x193   :  { %470 = vmatpush3.xpose.msk.msra.mxu1 %vm300_vm5, %v296_v33 }
 0x196   :  { %472 = vmatmul.mubr.msk.f32.vlgmr.msra.gmra.mxu1 %vm300_vm5, %v297_v34 }
 0x256   :  { %v373_v36 = vpop.f32.mrf.mxu1 }
 0x257   :  { %v374_v37 = vadd.f32 %v373_v36, %v299_v35 }
 0x258   :  { %v473_v38 = vpop.f32.mrf.mxu1 }
 0x259   :  { %378 = vst.msk [vmem:[#allocation3] sm:$0x1] %vm377_vm6, %v374_v37 }
 0x25a   :  { %488 = shalt.err (!%p485_p4)
}
 0x25b   :  { %388 = dma.vmem_to_hbm [thread:$0]  %s386_s27, 16, %s663_s9, [#allocation4]  }
 0x25c   :  { %497 = dma.done.wait [#allocation4], 16  }
 0x25d   :  { %498 = vsyncadd [#allocation4], 4294967280 }
 0x25e   :  { %392 = vsyncpa [#allocation4], 1 }

</bundles_post_ra>
